<compile_context>
chip_gen: v5e
topology: v5e:2x2
jax: 0.10.0
libtpu: 0.0.40
codegen_flags: <defaults>
</compile_context>

<pallas_src>
import jax
import jax.numpy as jnp
from jax.experimental import pallas as pl
from jax.experimental.pallas import tpu as pltpu

INTERM_DIM = 16
FEATURE_DIMS = (64, 32, 16)


def _round_up(x, m):
    return ((x + m - 1) // m) * m


def _lossnet_kernel(f1_ref, f2_ref, f3_ref,
                    w1_ref, w2_ref, w3_ref,
                    b1_ref, b2_ref, b3_ref,
                    w4a_ref, w4b_ref, w4c_ref, b4_ref,
                    out_ref):
    # Branch matmuls on the MXU, f32 accumulation, bias + ReLU on the VPU in f32.
    h1 = jnp.dot(f1_ref[...], w1_ref[...], preferred_element_type=jnp.float32)
    h2 = jnp.dot(f2_ref[...], w2_ref[...], preferred_element_type=jnp.float32)
    h3 = jnp.dot(f3_ref[...], w3_ref[...], preferred_element_type=jnp.float32)
    h1 = jnp.maximum(h1 + b1_ref[...], 0.0)
    h2 = jnp.maximum(h2 + b2_ref[...], 0.0)
    h3 = jnp.maximum(h3 + b3_ref[...], 0.0)
    # concat + final Linear, split per branch (avoids in-kernel lane concatenation).
    out = (jnp.dot(h1, w4a_ref[...], preferred_element_type=jnp.float32)
           + jnp.dot(h2, w4b_ref[...], preferred_element_type=jnp.float32)
           + jnp.dot(h3, w4c_ref[...], preferred_element_type=jnp.float32))
    out_ref[...] = (out + b4_ref[0, 0]).astype(out_ref.dtype)


def lossnet_forward(features, params, *, block_b=4096):
    """features: ((B,64), (B,32), (B,16)); params: dict of (transposed) PyTorch weights."""
    f1, f2, f3 = features
    B = f1.shape[0]
    d1, d2, d3 = FEATURE_DIMS
    dt = f1.dtype

    # Batch tile: multiple of 8 sublanes, capped at block_b; partial last block is fine.
    tb = block_b if B >= block_b else _round_up(B, 8)
    grid = (pl.cdiv(B, tb),)

    # Branch weights match the activation dtype (bf16 path keeps f32 accumulation);
    # biases and the tiny final projection stay f32.
    w1 = params["w1"].astype(dt)
    w2 = params["w2"].astype(dt)
    w3 = params["w3"].astype(dt)
    b1 = params["b1"].reshape(1, INTERM_DIM).astype(jnp.float32)
    b2 = params["b2"].reshape(1, INTERM_DIM).astype(jnp.float32)
    b3 = params["b3"].reshape(1, INTERM_DIM).astype(jnp.float32)
    w4 = params["w4"].reshape(3 * INTERM_DIM, 1).astype(jnp.float32)
    w4a = w4[0:INTERM_DIM]
    w4b = w4[INTERM_DIM:2 * INTERM_DIM]
    w4c = w4[2 * INTERM_DIM:3 * INTERM_DIM]
    b4 = params["b4"].reshape(1, 1).astype(jnp.float32)

    isz = jnp.dtype(dt).itemsize
    cost = pl.CostEstimate(
        flops=2 * B * (d1 + d2 + d3) * INTERM_DIM + 2 * B * 3 * INTERM_DIM,
        transcendentals=0,
        bytes_accessed=(B * (d1 + d2 + d3) * isz                 # features in
                        + (d1 + d2 + d3) * INTERM_DIM * isz      # branch weights
                        + 3 * INTERM_DIM * 4 * 2 + 4             # biases + w4 + b4
                        + B * 4),                                # output
    )

    const = lambda i: (0, 0)
    batch = lambda i: (i, 0)

    out = pl.pallas_call(
        _lossnet_kernel,
        out_shape=jax.ShapeDtypeStruct((B, 1), jnp.float32),
        grid_spec=pltpu.PrefetchScalarGridSpec(
            num_scalar_prefetch=0,
            grid=grid,
            in_specs=[
                pl.BlockSpec((tb, d1), batch),                 # f1 tile
                pl.BlockSpec((tb, d2), batch),                 # f2 tile
                pl.BlockSpec((tb, d3), batch),                 # f3 tile
                pl.BlockSpec((d1, INTERM_DIM), const),         # w1 (VMEM-resident)
                pl.BlockSpec((d2, INTERM_DIM), const),         # w2
                pl.BlockSpec((d3, INTERM_DIM), const),         # w3
                pl.BlockSpec((1, INTERM_DIM), const),          # b1 (f32)
                pl.BlockSpec((1, INTERM_DIM), const),          # b2
                pl.BlockSpec((1, INTERM_DIM), const),          # b3
                pl.BlockSpec((INTERM_DIM, 1), const),          # w4[:16]
                pl.BlockSpec((INTERM_DIM, 1), const),          # w4[16:32]
                pl.BlockSpec((INTERM_DIM, 1), const),          # w4[32:48]
                pl.BlockSpec(memory_space=pltpu.SMEM),         # b4 scalar
            ],
            out_specs=pl.BlockSpec((tb, 1), batch),
        ),
        compiler_params=pltpu.CompilerParams(
            dimension_semantics=("parallel",),
        ),
        cost_estimate=cost,
    )(f1, f2, f3, w1, w2, w3, b1, b2, b3, w4a, w4b, w4c, b4)

    return out


def init_params(key, interm_dim=INTERM_DIM):
    """Deterministic synthetic parameters matching the PyTorch module's shapes."""
    ks = jax.random.split(key, 8)

    def lin(kw, kb, d_in, d_out):
        bound = 1.0 / jnp.sqrt(jnp.float32(d_in))
        w = jax.random.uniform(kw, (d_in, d_out), jnp.float32, -bound, bound)
        b = jax.random.uniform(kb, (1, d_out), jnp.float32, -bound, bound)
        return w, b

    w1, b1 = lin(ks[0], ks[1], 64, interm_dim)
    w2, b2 = lin(ks[2], ks[3], 32, interm_dim)
    w3, b3 = lin(ks[4], ks[5], 16, interm_dim)
    w4, b4 = lin(ks[6], ks[7], 3 * interm_dim, 1)
    return dict(w1=w1, b1=b1, w2=w2, b2=b2, w3=w3, b3=b3, w4=w4, b4=b4)


def lossnet_reference(features, params):
    """Pure-JAX reference mirroring the PyTorch forward."""
    f1, f2, f3 = features
    x1 = jnp.maximum(f1 @ params["w1"] + params["b1"], 0.0)
    x2 = jnp.maximum(f2 @ params["w2"] + params["b2"], 0.0)
    x3 = jnp.maximum(f3 @ params["w3"] + params["b3"], 0.0)
    x = jnp.concatenate([x1, x2, x3], axis=1)
    return x @ params["w4"] + params["b4"]


if __name__ == "__main__":
    key = jax.random.PRNGKey(0)
    k_params, k1, k2, k3 = jax.random.split(key, 4)

    B = 8
    features = (
        jax.random.normal(k1, (B, 64), jnp.float32),
        jax.random.normal(k2, (B, 32), jnp.float32),
        jax.random.normal(k3, (B, 16), jnp.float32),
    )
    params = init_params(k_params)
    ref = lossnet_reference(features, params)

    # f32 path: tight check against the pure-JAX reference.
    out = jax.block_until_ready(lossnet_forward(features, params))
    assert out.shape == (B, 1), out.shape
    assert jnp.allclose(out, ref, atol=1e-4, rtol=1e-4), (out, ref)

    # bf16 activation path (halves feature HBM traffic): looser tolerance vs f32 reference.
    features_bf16 = tuple(f.astype(jnp.bfloat16) for f in features)
    out_bf16 = jax.block_until_ready(lossnet_forward(features_bf16, params))
    assert out_bf16.shape == (B, 1), out_bf16.shape
    assert jnp.allclose(out_bf16, ref, atol=5e-2, rtol=5e-2), (out_bf16, ref)

    print("KERNEL_OK")
</pallas_src>

<mosaic_0001>
module attributes {stable_mosaic.version = 11 : i64} {
  func.func @_lossnet_kernel(%arg0: i32, %arg1: memref<8x64xf32, #tpu.memory_space<vmem>>, %arg2: memref<8x32xf32, #tpu.memory_space<vmem>>, %arg3: memref<8x16xf32, #tpu.memory_space<vmem>>, %arg4: memref<64x16xf32, #tpu.memory_space<vmem>>, %arg5: memref<32x16xf32, #tpu.memory_space<vmem>>, %arg6: memref<16x16xf32, #tpu.memory_space<vmem>>, %arg7: memref<1x16xf32, #tpu.memory_space<vmem>>, %arg8: memref<1x16xf32, #tpu.memory_space<vmem>>, %arg9: memref<1x16xf32, #tpu.memory_space<vmem>>, %arg10: memref<16x1xf32, #tpu.memory_space<vmem>>, %arg11: memref<16x1xf32, #tpu.memory_space<vmem>>, %arg12: memref<16x1xf32, #tpu.memory_space<vmem>>, %arg13: memref<1x1xf32, #tpu.memory_space<smem>>, %arg14: memref<8x1xf32, #tpu.memory_space<vmem>>) attributes {dimension_semantics = [#tpu.dimension_semantics<parallel>], iteration_bounds = array<i64: 1>, scalar_prefetch = 0 : i64, scratch_operands = 0 : i64, tpu.core_type = #tpu.core_type<tc>, window_params = [{transform_indices = @transform_0, window_bounds = array<i64: 8, 64>}, {transform_indices = @transform_1, window_bounds = array<i64: 8, 32>}, {transform_indices = @transform_2, window_bounds = array<i64: 8, 16>}, {pipeline_mode = #tpu.pipeline_mode<synchronous>, transform_indices = @transform_3, window_bounds = array<i64: 64, 16>}, {pipeline_mode = #tpu.pipeline_mode<synchronous>, transform_indices = @transform_4, window_bounds = array<i64: 32, 16>}, {pipeline_mode = #tpu.pipeline_mode<synchronous>, transform_indices = @transform_5, window_bounds = array<i64: 16, 16>}, {pipeline_mode = #tpu.pipeline_mode<synchronous>, transform_indices = @transform_6, window_bounds = array<i64: 1, 16>}, {pipeline_mode = #tpu.pipeline_mode<synchronous>, transform_indices = @transform_7, window_bounds = array<i64: 1, 16>}, {pipeline_mode = #tpu.pipeline_mode<synchronous>, transform_indices = @transform_8, window_bounds = array<i64: 1, 16>}, {pipeline_mode = #tpu.pipeline_mode<synchronous>, transform_indices = @transform_9, window_bounds = array<i64: 16, 1>}, {pipeline_mode = #tpu.pipeline_mode<synchronous>, transform_indices = @transform_10, window_bounds = array<i64: 16, 1>}, {pipeline_mode = #tpu.pipeline_mode<synchronous>, transform_indices = @transform_11, window_bounds = array<i64: 16, 1>}, {transform_indices = @transform_12, window_bounds = array<i64: 1, 1>}, {transform_indices = @transform_13, window_bounds = array<i64: 8, 1>}]} {
    %c0 = arith.constant 0 : index
    %c0_0 = arith.constant 0 : index
    %0 = vector.load %arg1[%c0, %c0_0] : memref<8x64xf32, #tpu.memory_space<vmem>>, vector<8x64xf32>
    %c0_1 = arith.constant 0 : index
    %c0_2 = arith.constant 0 : index
    %1 = vector.load %arg4[%c0_1, %c0_2] : memref<64x16xf32, #tpu.memory_space<vmem>>, vector<64x16xf32>
    %cst = arith.constant dense<0.000000e+00> : vector<8x16xf32>
    %2 = tpu.matmul %0, %1, %cst {dimension_numbers = #tpu.dot_dimension_numbers<[1], [0], [0], [1], [0, 0, 1, 1], [], []>} : vector<8x64xf32>, vector<64x16xf32>, vector<8x16xf32> -> vector<8x16xf32>
    %c0_3 = arith.constant 0 : index
    %c0_4 = arith.constant 0 : index
    %3 = vector.load %arg2[%c0_3, %c0_4] : memref<8x32xf32, #tpu.memory_space<vmem>>, vector<8x32xf32>
    %c0_5 = arith.constant 0 : index
    %c0_6 = arith.constant 0 : index
    %4 = vector.load %arg5[%c0_5, %c0_6] : memref<32x16xf32, #tpu.memory_space<vmem>>, vector<32x16xf32>
    %cst_7 = arith.constant dense<0.000000e+00> : vector<8x16xf32>
    %5 = tpu.matmul %3, %4, %cst_7 {dimension_numbers = #tpu.dot_dimension_numbers<[1], [0], [0], [1], [0, 0, 1, 1], [], []>} : vector<8x32xf32>, vector<32x16xf32>, vector<8x16xf32> -> vector<8x16xf32>
    %c0_8 = arith.constant 0 : index
    %c0_9 = arith.constant 0 : index
    %6 = vector.load %arg3[%c0_8, %c0_9] : memref<8x16xf32, #tpu.memory_space<vmem>>, vector<8x16xf32>
    %c0_10 = arith.constant 0 : index
    %c0_11 = arith.constant 0 : index
    %7 = vector.load %arg6[%c0_10, %c0_11] : memref<16x16xf32, #tpu.memory_space<vmem>>, vector<16x16xf32>
    %cst_12 = arith.constant dense<0.000000e+00> : vector<8x16xf32>
    %8 = tpu.matmul %6, %7, %cst_12 {dimension_numbers = #tpu.dot_dimension_numbers<[1], [0], [0], [1], [0, 0, 1, 1], [], []>} : vector<8x16xf32>, vector<16x16xf32>, vector<8x16xf32> -> vector<8x16xf32>
    %c0_13 = arith.constant 0 : index
    %c0_14 = arith.constant 0 : index
    %9 = vector.load %arg7[%c0_13, %c0_14] : memref<1x16xf32, #tpu.memory_space<vmem>>, vector<1x16xf32>
    %10 = vector.broadcast %9 : vector<1x16xf32> to vector<8x16xf32>
    %11 = arith.addf %2, %10 : vector<8x16xf32>
    %cst_15 = arith.constant 0.000000e+00 : f32
    %12 = vector.broadcast %cst_15 : f32 to vector<8x16xf32>
    %13 = arith.maximumf %11, %12 : vector<8x16xf32>
    %c0_16 = arith.constant 0 : index
    %c0_17 = arith.constant 0 : index
    %14 = vector.load %arg8[%c0_16, %c0_17] : memref<1x16xf32, #tpu.memory_space<vmem>>, vector<1x16xf32>
    %15 = vector.broadcast %14 : vector<1x16xf32> to vector<8x16xf32>
    %16 = arith.addf %5, %15 : vector<8x16xf32>
    %cst_18 = arith.constant 0.000000e+00 : f32
    %17 = vector.broadcast %cst_18 : f32 to vector<8x16xf32>
    %18 = arith.maximumf %16, %17 : vector<8x16xf32>
    %c0_19 = arith.constant 0 : index
    %c0_20 = arith.constant 0 : index
    %19 = vector.load %arg9[%c0_19, %c0_20] : memref<1x16xf32, #tpu.memory_space<vmem>>, vector<1x16xf32>
    %20 = vector.broadcast %19 : vector<1x16xf32> to vector<8x16xf32>
    %21 = arith.addf %8, %20 : vector<8x16xf32>
    %cst_21 = arith.constant 0.000000e+00 : f32
    %22 = vector.broadcast %cst_21 : f32 to vector<8x16xf32>
    %23 = arith.maximumf %21, %22 : vector<8x16xf32>
    %c0_22 = arith.constant 0 : index
    %c0_23 = arith.constant 0 : index
    %24 = vector.load %arg10[%c0_22, %c0_23] : memref<16x1xf32, #tpu.memory_space<vmem>>, vector<16x1xf32>
    %cst_24 = arith.constant dense<0.000000e+00> : vector<8x1xf32>
    %25 = tpu.matmul %13, %24, %cst_24 {dimension_numbers = #tpu.dot_dimension_numbers<[1], [0], [0], [1], [0, 0, 1, 1], [], []>} : vector<8x16xf32>, vector<16x1xf32>, vector<8x1xf32> -> vector<8x1xf32>
    %c0_25 = arith.constant 0 : index
    %c0_26 = arith.constant 0 : index
    %26 = vector.load %arg11[%c0_25, %c0_26] : memref<16x1xf32, #tpu.memory_space<vmem>>, vector<16x1xf32>
    %cst_27 = arith.constant dense<0.000000e+00> : vector<8x1xf32>
    %27 = tpu.matmul %18, %26, %cst_27 {dimension_numbers = #tpu.dot_dimension_numbers<[1], [0], [0], [1], [0, 0, 1, 1], [], []>} : vector<8x16xf32>, vector<16x1xf32>, vector<8x1xf32> -> vector<8x1xf32>
    %28 = arith.addf %25, %27 : vector<8x1xf32>
    %c0_28 = arith.constant 0 : index
    %c0_29 = arith.constant 0 : index
    %29 = vector.load %arg12[%c0_28, %c0_29] : memref<16x1xf32, #tpu.memory_space<vmem>>, vector<16x1xf32>
    %cst_30 = arith.constant dense<0.000000e+00> : vector<8x1xf32>
    %30 = tpu.matmul %23, %29, %cst_30 {dimension_numbers = #tpu.dot_dimension_numbers<[1], [0], [0], [1], [0, 0, 1, 1], [], []>} : vector<8x16xf32>, vector<16x1xf32>, vector<8x1xf32> -> vector<8x1xf32>
    %31 = arith.addf %28, %30 : vector<8x1xf32>
    %c0_31 = arith.constant 0 : index
    %c0_32 = arith.constant 0 : index
    %32 = memref.load %arg13[%c0_31, %c0_32] : memref<1x1xf32, #tpu.memory_space<smem>>
    %33 = vector.broadcast %32 : f32 to vector<8x1xf32>
    %34 = arith.addf %31, %33 : vector<8x1xf32>
    %c0_33 = arith.constant 0 : index
    %c0_34 = arith.constant 0 : index
    %35 = vector.load %arg14[%c0_33, %c0_34] : memref<8x1xf32, #tpu.memory_space<vmem>>, vector<8x1xf32>
    tpu.vector_store %arg14[%c0_33, %c0_34], %34 {strides = array<i32>} : memref<8x1xf32, #tpu.memory_space<vmem>>, vector<8x1xf32>,
    return
  }
  func.func @transform_0(%arg0: i32) -> (i32, i32) {
    %c0_i32 = arith.constant 0 : i32
    %c0_i32_0 = arith.constant 0 : i32
    return %arg0, %c0_i32 : i32, i32
  }
  func.func @transform_1(%arg0: i32) -> (i32, i32) {
    %c0_i32 = arith.constant 0 : i32
    %c0_i32_0 = arith.constant 0 : i32
    return %arg0, %c0_i32 : i32, i32
  }
  func.func @transform_2(%arg0: i32) -> (i32, i32) {
    %c0_i32 = arith.constant 0 : i32
    %c0_i32_0 = arith.constant 0 : i32
    return %arg0, %c0_i32 : i32, i32
  }
  func.func @transform_3(%arg0: i32) -> (i32, i32) {
    %c0_i32 = arith.constant 0 : i32
    %c0_i32_0 = arith.constant 0 : i32
    %c0_i32_1 = arith.constant 0 : i32
    return %c0_i32, %c0_i32_0 : i32, i32
  }
  func.func @transform_4(%arg0: i32) -> (i32, i32) {
    %c0_i32 = arith.constant 0 : i32
    %c0_i32_0 = arith.constant 0 : i32
    %c0_i32_1 = arith.constant 0 : i32
    return %c0_i32, %c0_i32_0 : i32, i32
  }
  func.func @transform_5(%arg0: i32) -> (i32, i32) {
    %c0_i32 = arith.constant 0 : i32
    %c0_i32_0 = arith.constant 0 : i32
    %c0_i32_1 = arith.constant 0 : i32
    return %c0_i32, %c0_i32_0 : i32, i32
  }
  func.func @transform_6(%arg0: i32) -> (i32, i32) {
    %c0_i32 = arith.constant 0 : i32
    %c0_i32_0 = arith.constant 0 : i32
    %c0_i32_1 = arith.constant 0 : i32
    return %c0_i32, %c0_i32_0 : i32, i32
  }
  func.func @transform_7(%arg0: i32) -> (i32, i32) {
    %c0_i32 = arith.constant 0 : i32
    %c0_i32_0 = arith.constant 0 : i32
    %c0_i32_1 = arith.constant 0 : i32
    return %c0_i32, %c0_i32_0 : i32, i32
  }
  func.func @transform_8(%arg0: i32) -> (i32, i32) {
    %c0_i32 = arith.constant 0 : i32
    %c0_i32_0 = arith.constant 0 : i32
    %c0_i32_1 = arith.constant 0 : i32
    return %c0_i32, %c0_i32_0 : i32, i32
  }
  func.func @transform_9(%arg0: i32) -> (i32, i32) {
    %c0_i32 = arith.constant 0 : i32
    %c0_i32_0 = arith.constant 0 : i32
    %c0_i32_1 = arith.constant 0 : i32
    return %c0_i32, %c0_i32_0 : i32, i32
  }
  func.func @transform_10(%arg0: i32) -> (i32, i32) {
    %c0_i32 = arith.constant 0 : i32
    %c0_i32_0 = arith.constant 0 : i32
    %c0_i32_1 = arith.constant 0 : i32
    return %c0_i32, %c0_i32_0 : i32, i32
  }
  func.func @transform_11(%arg0: i32) -> (i32, i32) {
    %c0_i32 = arith.constant 0 : i32
    %c0_i32_0 = arith.constant 0 : i32
    %c0_i32_1 = arith.constant 0 : i32
    return %c0_i32, %c0_i32_0 : i32, i32
  }
  func.func @transform_12(%arg0: i32) -> (i32, i32) {
    %c0_i32 = arith.constant 0 : i32
    %c0_i32_0 = arith.constant 0 : i32
    %c0_i32_1 = arith.constant 0 : i32
    return %c0_i32, %c0_i32_0 : i32, i32
  }
  func.func @transform_13(%arg0: i32) -> (i32, i32) {
    %c0_i32 = arith.constant 0 : i32
    %c0_i32_0 = arith.constant 0 : i32
    return %arg0, %c0_i32 : i32, i32
  }
}

</mosaic_0001>

<bundles_post_ra>
// kernel: tpu_custom_call.1
= control target key start
LH: loop header
LB: loop body
LE: loop exit
PB: predicated region body
PF: predicated region fallthrough
CT: control target
= control target key end

     0   :  { %vm95_vm0 = vcmask 261120   ;;  %vm124_vm1 = vcmask 130048   ;;  %vm66_vm2 = vcmask 523264   ;;  %vm228_vm3 = vcmask 7168   ;;  %s401_s3 = inlined_call_operand.vmem [shape: f32[64,16], index: 3, kind: input, shape index: {}]   ;;  %s402_s4 = inlined_call_operand.vmem [shape: f32[32,16], index: 4, kind: input, shape index: {}]   ;;  %s403_s5 = inlined_call_operand.vmem [shape: f32[16,16], index: 5, kind: input, shape index: {}]   ;;  %s404_s1 = inlined_call_operand.vmem [shape: f32[8,32], index: 1, kind: input, shape index: {}]   ;;  %s405_s2 = inlined_call_operand.vmem [shape: f32[8,16], index: 2, kind: input, shape index: {}]   ;;  %s406_s7 = inlined_call_operand.vmem [shape: f32[1,16], index: 7, kind: input, shape index: {}]   ;;  %s407_s0 = inlined_call_operand.vmem [shape: f32[8,64], index: 0, kind: input, shape index: {}]   ;;  %s408_s6 = inlined_call_operand.vmem [shape: f32[1,16], index: 6, kind: input, shape index: {}]   ;;  %s409_s8 = inlined_call_operand.vmem [shape: f32[1,16], index: 8, kind: input, shape index: {}]   ;;  %s410_s10 = inlined_call_operand.vmem [shape: f32[16,1], index: 10, kind: input, shape index: {}]   ;;  %s411_s9 = inlined_call_operand.vmem [shape: f32[16,1], index: 9, kind: input, shape index: {}]   ;;  %s412_s11 = inlined_call_operand.vmem [shape: f32[16,1], index: 11, kind: input, shape index: {}]   ;;  %s413_s12 = inlined_call_operand.<no memory space> [shape: f32[1,1], index: 12, kind: input, shape index: {}]   ;;  %s414_s13 = inlined_call_operand.vmem [shape: f32[8,1], index: 13, kind: output, shape index: {}]  }
   0x1   :  { %v53_v0 = vld [vmem:[%s401_s3 + $0x38] sm:$0xff]  ;;  %v52_v1 = vld [vmem:[%s401_s3 + $0x30] sm:$0xff]  ;;  %v51_v4 = vld [vmem:[%s401_s3 + $0x28] sm:$0xff]  ;;  %v226_v39 = vstv %s413_s12 }
   0x2   :  { %v58_v2 = vld [vmem:[%s402_s4 + $0x18] sm:$0xff]  ;;  %78 = vmatpush.msra.mxu0 %v53_v0  ;;  %v57_v3 = vld [vmem:[%s402_s4 + $0x10] sm:$0xff]  ;;  %v56_v5 = vld [vmem:[%s402_s4 + $0x8] sm:$0xff] }
   0x3   :  { %111 = vmatpush.msra.mxu1 %v58_v2  ;;  %v61_v6 = vld [vmem:[%s403_s5 + $0x8] sm:$0xff]  ;;  %v50_v7 = vld [vmem:[%s401_s3 + $0x20] sm:$0xff]  ;;  %v49_v12 = vld [vmem:[%s401_s3 + $0x18] sm:$0xff] }
   0x4   :  { %79 = vmatpush.msra.mxu0 %v52_v1  ;;  %v55_v8 = vld [vmem:[%s402_s4] sm:$0xff]  ;;  %142 = vmatpush.msra.mxu2 %v61_v6  ;;  %v48_v13 = vld [vmem:[%s401_s3 + $0x10] sm:$0xff]  ;;  %v47_v14 = vld [vmem:[%s401_s3 + $0x8] sm:$0xff] }
   0x5   :  { %112 = vmatpush.msra.mxu1 %v57_v3  ;;  %v60_v9 = vld [vmem:[%s403_s5] sm:$0xff]  ;;  %v152_v17 = vld [vmem:[%s410_s10 + $0x8] sm:$0xff] }
   0x6   :  { %80 = vmatpush.msra.mxu0 %v51_v4  ;;  %v54_v10 = vld [vmem:[%s404_s1] sm:$0xff]  ;;  %143 = vmatpush.msra.mxu2 %v60_v9  ;;  %v150_v18 = vld [vmem:[%s411_s9 + $0x8] sm:$0xff] }
   0x7   :  { %113 = vmatpush.msra.mxu1 %v56_v5  ;;  %v59_v11 = vld [vmem:[%s405_s2] sm:$0xff]  ;;  %170 = vmatpush.msra.mxu3 %v152_v17  ;;  %v200_v20 = vld [vmem:[%s412_s11 + $0x8] sm:$0xff] }
   0x8   :  { %81 = vmatpush.msra.mxu0 %v50_v7  ;;  %236 = vmatmul.msk.f32.vlgmr.msra.gmra.mxu2 %vm124_vm1, %v59_v11  ;;  %v46_v15 = vld [vmem:[%s401_s3] sm:$0xff] }
   0x9   :  { %114 = vmatpush.msra.mxu1 %v55_v8  ;;  %v45_v16 = vld [vmem:[%s407_s0] sm:$0xff]  ;;  %193 = vmatpush.msrb.mxu2 %v150_v18 }
   0xa   :  { %235 = vmatmul.msk.f32.vlgmr.msra.gmra.mxu1 %vm95_vm0, %v54_v10  ;;  %82 = vmatpush.msra.mxu0 %v49_v12  ;;  %v151_v19 = vld [vmem:[%s410_s10] sm:$0xff] }
   0xb   :  { %171 = vmatpush.msra.mxu3 %v151_v19  ;;  %v149_v21 = vld [vmem:[%s411_s9] sm:$0xff] }
   0xc   :  { %83 = vmatpush.msra.mxu0 %v48_v13  ;;  %v199_v22 = vld [vmem:[%s412_s11] sm:$0xff]  ;;  %194 = vmatpush.msrb.mxu2 %v149_v21 }
   0xd   :  { %218 = vmatpush.msrb.mxu3 %v200_v20  ;;  %v240_v23 = vld [vmem:[%s406_s7] ss:$0 sm:$0xff] }
   0xe   :  { %84 = vmatpush.msra.mxu0 %v47_v14  ;;  %v242_v27 = vld [vmem:[%s409_s8] ss:$0 sm:$0xff] }
   0xf   :  { %219 = vmatpush.msrb.mxu3 %v199_v22  ;;  %v241_v28 = vld [vmem:[%s408_s6] ss:$0 sm:$0xff] }
  0x10   :  { %85 = vmatpush.msra.mxu0 %v46_v15 }
  0x11   :  { %234 = vmatmul.msk.f32.vlgmr.msra.gmra.mxu0 %vm66_vm2, %v45_v16 }
  0x87   :  { %v116_v24 = vpop.f32.mrf.mxu1 }
  0x88   :  { %v117_v25 = vadd.f32 %v240_v23, %v116_v24 }
  0x8a   :  { %v119_v26 = vmax.f32 %v117_v25, 0.0 }
  0x8b   :  { %v145_v29 = vpop.f32.mrf.mxu2 }
  0x8c   :  { %237 = vmatmul.msk.f32.vlgmr.msra.gmra.mxu3 %vm124_vm1, %v119_v26  ;;  %v146_v30 = vadd.f32 %v242_v27, %v145_v29 }
  0x8e   :  { %v87_v31 = vpop.f32.mrf.mxu0  ;;  %v148_v33 = vmax.f32 %v146_v30, 0.0 }
  0x8f   :  { %v88_v32 = vadd.f32 %v241_v28, %v87_v31 }
  0x91   :  { %v90_v34 = vmax.f32 %v88_v32, 0.0 }
  0x93   :  { %238 = vmatmul.msk.f32.vlgmr.msrb.gmra.mxu2 %vm124_vm1, %v90_v34 }
  0x94   :  { %239 = vmatmul.msk.f32.vlgmr.msrb.gmra.mxu3 %vm124_vm1, %v148_v33 }
 0x10f   :  { %v173_v35 = vpop.f32.mrf.mxu3 }
 0x116   :  { %v196_v36 = vpop.f32.mrf.mxu2 }
 0x117   :  { %v221_v37 = vpop.f32.mrf.mxu3  ;;  %v197_v38 = vadd.f32 %v196_v36, %v173_v35 }
 0x119   :  { %v224_v40 = vadd.f32 %v221_v37, %v197_v38 }
 0x11b   :  { %v227_v41 = vadd.f32 %v226_v39, %v224_v40 }
 0x11d   :  { %229 = vst.msk [vmem:[%s414_s13] sm:$0xff] %vm228_vm3, %v227_v41 }

</bundles_post_ra>
